<compile_context>
chip_gen: v7x
topology: tpu7x:2x2x1
jax: 0.10.0
libtpu: 0.0.40
codegen_flags: <defaults>
</compile_context>

<pallas_src>
import jax
import jax.numpy as jnp
from jax.experimental import pallas as pl
from jax.experimental.pallas import tpu as pltpu


def _round_up(x, m):
    return ((x + m - 1) // m) * m


def _value_head_kernel(h_ref, w_ref, b_ref, o_ref):
    # h_ref: (tile_r, H) bf16/f32   w_ref: (1, H) f32   b_ref: (1, 1) f32 in SMEM
    # o_ref: (tile_r, 1) f32
    h = h_ref[...].astype(jnp.float32)              # f32 accumulate (safe on v5e too)
    w = w_ref[...]                                  # (1, H), broadcasts over rows
    o_ref[...] = jnp.sum(h * w, axis=-1, keepdims=True) + b_ref[0, 0]


def value_head_pallas(hidden_rows, weight_row, bias, *, tile_r=1024):
    """hidden_rows: (N, H) bf16/f32, weight_row: (1, H) f32, bias: (1, 1) f32 -> (N, 1) f32."""
    n, h = hidden_rows.shape
    itemsize = hidden_rows.dtype.itemsize
    # Native sublane tile: 8 rows for 4-byte, 16 for 2-byte, 32 for 1-byte dtypes.
    row_align = 32 // itemsize if itemsize < 4 else 8

    # Pad rows (rare) so block sublane dims stay aligned to the native tiling.
    n_pad = _round_up(n, row_align)
    if n_pad != n:
        hidden_rows = jnp.pad(hidden_rows, ((0, n_pad - n), (0, 0)))

    # Big row tiles for this HBM-streaming kernel, but keep >=2 grid steps when
    # possible so the v7x megacore can split the "parallel" row axis across TCs.
    tile_r = _round_up(max(tile_r, row_align), row_align)
    two_step = _round_up(pl.cdiv(n_pad, 2), row_align)
    tile_r = min(tile_r, n_pad, max(two_step, row_align))
    grid = (pl.cdiv(n_pad, tile_r),)

    # Budget: double-buffered hidden tile + double-buffered output + resident
    # weight, with 2x headroom; floor at the usual scoped default, cap at 64 MiB
    # so the same sizing also fits v7x physical VMEM.
    vmem_bytes = 2 * (2 * tile_r * h * itemsize + 2 * tile_r * 4 + h * 4) + (1 << 20)
    vmem_limit = int(min(64 * 1024 * 1024, max(32 * 1024 * 1024, vmem_bytes)))

    out = pl.pallas_call(
        _value_head_kernel,
        out_shape=jax.ShapeDtypeStruct((n_pad, 1), jnp.float32),
        grid_spec=pltpu.PrefetchScalarGridSpec(
            num_scalar_prefetch=0,
            grid=grid,
            in_specs=[
                pl.BlockSpec((tile_r, h), lambda i: (i, 0)),          # streamed rows
                pl.BlockSpec((1, h), lambda i: (0, 0)),               # resident weight
                pl.BlockSpec(memory_space=pltpu.MemorySpace.SMEM),    # scalar bias
            ],
            out_specs=pl.BlockSpec((tile_r, 1), lambda i: (i, 0)),
        ),
        compiler_params=pltpu.CompilerParams(
            dimension_semantics=("parallel",),
            vmem_limit_bytes=vmem_limit,
        ),
    )(hidden_rows, weight_row, bias)
    return out[:n]


def value_forward(queries, query_attn_masks, responses, embed_table, vh_weight, vh_bias):
    """Mirrors Value/AutoregressiveValue.forward -> dict(values=(B, Tr))."""
    del query_attn_masks  # only consumed by the (untranslated) base_model attention
    b, tq = queries.shape
    _, tr = responses.shape

    # sequences = cat([queries, responses], dim=1)
    sequences = jnp.concatenate([queries, responses], axis=1)                    # (B, Tq+Tr)

    # --- base_model stand-in -------------------------------------------------
    # TODO(synk): real transformer forward not implemented in Pallas.
    # The module needs last_hidden_state[:, tq-1 : tq-1+tr, :]; since the
    # stand-in is a lookup we gather exactly that token window, so the
    # (B, Tr, H) hidden block is produced directly in bf16 — no full-(B, T, H)
    # slice / f32-upcast copy is written to and re-read from HBM before the kernel.
    window_tokens = jax.lax.dynamic_slice_in_dim(sequences, tq - 1, tr, axis=1)  # (B, Tr)
    hidden = embed_table[window_tokens]                                          # (B, Tr, H) bf16

    h = hidden.shape[-1]
    hidden_rows = hidden.reshape(b * tr, h)                                      # free reshape
    values_rows = value_head_pallas(hidden_rows, vh_weight, vh_bias)             # (B*Tr, 1) f32
    values = values_rows.reshape(b, tr)                                          # squeeze(-1)
    return dict(values=values)


if __name__ == "__main__":
    key = jax.random.PRNGKey(0)
    k_q, k_r, k_e, k_w, k_b = jax.random.split(key, 5)

    B, TQ, TR, H, VOCAB = 2, 8, 8, 128, 64
    PAD_ID = 0

    queries = jax.random.randint(k_q, (B, TQ), 1, VOCAB, dtype=jnp.int32)
    responses = jax.random.randint(k_r, (B, TR), 1, VOCAB, dtype=jnp.int32)
    query_attn_masks = (queries != PAD_ID).astype(jnp.int32)

    # Deterministic bf16 stand-in for base_model hidden states.
    embed_table = jax.random.normal(k_e, (VOCAB, H), dtype=jnp.float32).astype(jnp.bfloat16)

    # (1) Module-faithful value head: nn.Linear(H, 1) with zero-initialized params
    #     (torch Linear weight layout is (out=1, in=H), i.e. a (1, H) row).
    vh_weight0 = jnp.zeros((1, H), dtype=jnp.float32)
    vh_bias0 = jnp.zeros((1, 1), dtype=jnp.float32)
    out0 = value_forward(queries, query_attn_masks, responses, embed_table, vh_weight0, vh_bias0)
    values0 = jax.block_until_ready(out0["values"])
    assert values0.shape == (B, TR)
    assert jnp.allclose(values0, jnp.zeros((B, TR), jnp.float32))

    # (2) Non-trivial weights to actually exercise the kernel numerics.
    vh_weight = 0.05 * jax.random.normal(k_w, (1, H), dtype=jnp.float32)
    vh_bias = jax.random.normal(k_b, (1, 1), dtype=jnp.float32)
    out = value_forward(queries, query_attn_masks, responses, embed_table, vh_weight, vh_bias)
    values = jax.block_until_ready(out["values"])

    # Plain-JAX reference (same bf16 hidden states, f32 math).
    seq = jnp.concatenate([queries, responses], axis=1)
    hidden_ref = embed_table[seq][:, TQ - 1: TQ - 1 + TR, :].astype(jnp.float32)
    values_ref = hidden_ref @ vh_weight[0] + vh_bias[0, 0]
    assert values.shape == (B, TR)
    assert jnp.allclose(values, values_ref, atol=1e-4, rtol=1e-4)

    print("KERNEL_OK")
</pallas_src>

<mosaic_0001>
module attributes {stable_mosaic.version = 11 : i64} {
  func.func @_value_head_kernel(%arg0: i32, %arg1: memref<16x128xbf16, #tpu.memory_space<vmem>>, %arg2: memref<1x128xf32, #tpu.memory_space<vmem>>, %arg3: memref<1x1xf32, #tpu.memory_space<smem>>, %arg4: memref<16x1xf32, #tpu.memory_space<vmem>>) attributes {dimension_semantics = [#tpu.dimension_semantics<parallel>], iteration_bounds = array<i64: 1>, scalar_prefetch = 0 : i64, scratch_operands = 0 : i64, tpu.core_type = #tpu.core_type<tc>, window_params = [{transform_indices = @transform_0, window_bounds = array<i64: 16, 128>}, {pipeline_mode = #tpu.pipeline_mode<synchronous>, transform_indices = @transform_1, window_bounds = array<i64: 1, 128>}, {transform_indices = @transform_2, window_bounds = array<i64: 1, 1>}, {transform_indices = @transform_3, window_bounds = array<i64: 16, 1>}]} {
    %c0 = arith.constant 0 : index
    %c0_0 = arith.constant 0 : index
    %0 = vector.load %arg1[%c0, %c0_0] : memref<16x128xbf16, #tpu.memory_space<vmem>>, vector<16x128xbf16>
    %1 = arith.extf %0 : vector<16x128xbf16> to vector<16x128xf32>
    %c0_1 = arith.constant 0 : index
    %c0_2 = arith.constant 0 : index
    %2 = vector.load %arg2[%c0_1, %c0_2] : memref<1x128xf32, #tpu.memory_space<vmem>>, vector<1x128xf32>
    %3 = vector.broadcast %2 : vector<1x128xf32> to vector<16x128xf32>
    %4 = arith.mulf %1, %3 : vector<16x128xf32>
    %cst = arith.constant dense<0.000000e+00> : vector<16xf32>
    %5 = vector.multi_reduction <add>, %4, %cst [1] : vector<16x128xf32> to vector<16xf32>
    %6 = vector.shape_cast %5 : vector<16xf32> to vector<16x1xf32>
    %c0_3 = arith.constant 0 : index
    %c0_4 = arith.constant 0 : index
    %7 = memref.load %arg3[%c0_3, %c0_4] : memref<1x1xf32, #tpu.memory_space<smem>>
    %8 = vector.broadcast %7 : f32 to vector<16x1xf32>
    %9 = arith.addf %6, %8 : vector<16x1xf32>
    %c0_5 = arith.constant 0 : index
    %c0_6 = arith.constant 0 : index
    %10 = vector.load %arg4[%c0_5, %c0_6] : memref<16x1xf32, #tpu.memory_space<vmem>>, vector<16x1xf32>
    tpu.vector_store %arg4[%c0_5, %c0_6], %9 {strides = array<i32>} : memref<16x1xf32, #tpu.memory_space<vmem>>, vector<16x1xf32>,
    return
  }
  func.func @transform_0(%arg0: i32) -> (i32, i32) {
    %c0_i32 = arith.constant 0 : i32
    %c0_i32_0 = arith.constant 0 : i32
    return %arg0, %c0_i32 : i32, i32
  }
  func.func @transform_1(%arg0: i32) -> (i32, i32) {
    %c0_i32 = arith.constant 0 : i32
    %c0_i32_0 = arith.constant 0 : i32
    %c0_i32_1 = arith.constant 0 : i32
    return %c0_i32, %c0_i32_0 : i32, i32
  }
  func.func @transform_2(%arg0: i32) -> (i32, i32) {
    %c0_i32 = arith.constant 0 : i32
    %c0_i32_0 = arith.constant 0 : i32
    %c0_i32_1 = arith.constant 0 : i32
    return %c0_i32, %c0_i32_0 : i32, i32
  }
  func.func @transform_3(%arg0: i32) -> (i32, i32) {
    %c0_i32 = arith.constant 0 : i32
    %c0_i32_0 = arith.constant 0 : i32
    return %arg0, %c0_i32 : i32, i32
  }
}

</mosaic_0001>

<bundles_post_ra>
// kernel: tpu_custom_call.1
= control target key start
LH: loop header
LB: loop body
LE: loop exit
PB: predicated region body
PF: predicated region fallthrough
CT: control target
= control target key end

     0   :  { %9 = vsyncpa [#allocation4], 0  ;;  %s90_s12 = smov [#allocation3]   ;;  %s137_s0 = inlined_call_operand.hbm [shape: bf16[16,128], index: 0, kind: input, shape index: {}]   ;;  %s138_s1 = inlined_call_operand.vmem [shape: f32[1,128], index: 1, kind: input, shape index: {}]   ;;  %s139_s2 = inlined_call_operand.<no memory space> [shape: f32[1,1], index: 2, kind: input, shape index: {}]   ;;  %s140_s3 = inlined_call_operand.vmem [shape: f32[16,1], index: 3, kind: output, shape index: {}]  }
   0x1   :  { %s15_s13 = sshll.u32 %s90_s12, 4  ;;  %s66_s16 = scalar_lea.hbm %s137_s0, 128  ;;  %s16_s13 = int_to_ptr.vmem [resolvable:$true] %s15_s13 }
   0x2   :  { %p67_p0 = scmp.ne.s32.totalorder %s137_s0, %s66_s16  ;;  %p70_p1 = scmp.lt.u32.totalorder %s66_s16, %s137_s0 }
   0x4   :  { %p72_p2 = pnand %p70_p1, %p67_p0 }
   0x6   :  { %75 = shalt.err (!%p72_p2)
}
   0x7   :  { %s76_s21 = scalar_lea.vmem %s16_s13, 128  ;;  %p81_p4 = scmp.lt.s32.totalorder %s16_s13, %s16_s13 }
   0x8   :  { %p77_p3 = scmp.ne.s32.totalorder %s16_s13, %s76_s21  ;;  %p82_p5 = scmp.lt.s32.totalorder %s76_s21, %s76_s21 }
   0xa   :  { %p83_p6 = por %p82_p5, %p81_p4 }
   0xc   :  { %p84_p7 = pnand %p83_p6, %p77_p3 }
   0xe   :  { %87 = shalt.err (!%p84_p7)
}
   0xf   :  { %s91_s22 = smov 64   ;;  %s92_s23 = smov 4  }
  0x10   :  { %21 = dma.hbm_to_vmem [thread:$0]  %s137_s0, 128, %s16_s13, [#allocation4], %s91_s22, %s91_s22, %s92_s23  }
  0x11   :  { %88 = dma.done.wait [#allocation4], 128  }
  0x12   :  { %89 = vsyncadd [#allocation4], 4294967168  ;;  %v60_v0 = vld [vmem:[#allocation3] sm:$0xff]   ;;  %v47_v6 = vstv %s139_s2  ;;  %vm50_vm0 = vcmask 7168  }
  0x13   :  { %v58_v1 = vld [vmem:[%s138_s1] ss:$0 sm:$0xff]  ;;  %v61_v2 = vunpack.c.l.bf16 %v60_v0  ;;  %v62_v3 = vunpack.c.h.bf16 %v60_v0 }
  0x15   :  { %v40_v4 = vmul.f32 %v61_v2, %v58_v1  ;;  %v41_v5 = vmul.f32 %v62_v3, %v58_v1 }
  0x17   :  { %42 = vadd.xlane.f32.xlu0 %v40_v4 }
  0x1b   :  { %44 = vadd.xlane.f32.xlu0 %v41_v5 }
  0xa4   :  { %v43_v7 = vpop.xlane.xlu0 %42 }
  0xa5   :  { %v48_v8 = vadd.f32 %v47_v6, %v43_v7 }
  0xa7   :  { %51 = vst.msk [vmem:[%s140_s3] sm:$0xff] %vm50_vm0, %v48_v8 }
  0xa8   :  { %v45_v9 = vpop.xlane.xlu0 %44 }
  0xa9   :  { %v49_v10 = vadd.f32 %v47_v6, %v45_v9 }
  0xab   :  { %52 = vst.msk [vmem:[%s140_s3 + $0x8] sm:$0xff] %vm50_vm0, %v49_v10 }
  0xac   :  { %57 = vsyncpa [#allocation4], 1 }

</bundles_post_ra>
